<compile_context>
chip_gen: v6e
topology: v6e:2x2x1
jax: 0.10.0
libtpu: 0.0.40
codegen_flags: <defaults>
</compile_context>

<pallas_src>
import functools

import jax
import jax.numpy as jnp
from jax.experimental import pallas as pl
from jax.experimental.pallas import tpu as pltpu


def _round_up(n, m):
  return ((n + m - 1) // m) * m


def _mlp_kernel(
    x_ref,
    w1_ref, b1_ref,
    w2_ref, b2_ref,
    w3_ref, b3_ref,
    w4_ref, b4_ref,
    out_ref,
    *,
    compute_dtype,
):
  x = x_ref[...].astype(compute_dtype)

  # Layer 1: Linear(input_dim, 128) -> ReLU   (BN1 folded into w2/b2)
  h = jnp.dot(x, w1_ref[...], preferred_element_type=jnp.float32) + b1_ref[...]
  h = jnp.maximum(h, 0.0)

  # Layer 2: Linear(128, 64) -> ReLU          (BN2 folded into w3/b3)
  h = jnp.dot(h.astype(compute_dtype), w2_ref[...],
              preferred_element_type=jnp.float32) + b2_ref[...]
  h = jnp.maximum(h, 0.0)

  # Layer 3: Linear(64, 32) -> ReLU           (BN3 folded into w4/b4)
  h = jnp.dot(h.astype(compute_dtype), w3_ref[...],
              preferred_element_type=jnp.float32) + b3_ref[...]
  h = jnp.maximum(h, 0.0)

  # Output head: Linear(32, num_classes padded to 128 lanes)
  y = jnp.dot(h.astype(compute_dtype), w4_ref[...],
              preferred_element_type=jnp.float32) + b4_ref[...]
  out_ref[...] = y.astype(out_ref.dtype)


def simple_cell_net_forward(x, params, *, batch_tile=512,
                            compute_dtype=jnp.float32):
  """Fused eval-mode forward. x: (B, input_dim) float32 -> (B, num_classes)."""
  B, D = x.shape
  num_classes = params["w4"].shape[1]
  eps = 1e-5

  # --- Host-side parameter preparation -------------------------------------
  def bn_scale_shift(g, be, rm, rv):
    scale = g * jax.lax.rsqrt(rv + eps)
    shift = be - rm * scale
    return scale, shift

  s1, t1 = bn_scale_shift(params["g1"], params["be1"], params["rm1"], params["rv1"])
  s2, t2 = bn_scale_shift(params["g2"], params["be2"], params["rm2"], params["rv2"])
  s3, t3 = bn_scale_shift(params["g3"], params["be3"], params["rm3"], params["rv3"])

  # Pad the output head to a lane-dense width (multiple of 128).
  out_pad = _round_up(max(num_classes, 128), 128)
  w4_padded = jnp.zeros((params["w4"].shape[0], out_pad), jnp.float32)
  w4_padded = w4_padded.at[:, :num_classes].set(params["w4"])
  b4_padded = jnp.zeros((out_pad,), jnp.float32)
  b4_padded = b4_padded.at[:num_classes].set(params["b4"])

  # Fold BN_k (scale s_k, shift t_k) into Linear_{k+1}.
  w1 = params["w1"]
  b1 = params["b1"]
  w2 = params["w2"] * s1[:, None]
  b2 = t1 @ params["w2"] + params["b2"]
  w3 = params["w3"] * s2[:, None]
  b3 = t2 @ params["w3"] + params["b3"]
  w4 = w4_padded * s3[:, None]
  b4 = t3 @ w4_padded + b4_padded

  if compute_dtype != jnp.float32:
    w1, w2, w3, w4 = (w.astype(compute_dtype) for w in (w1, w2, w3, w4))

  b1 = b1[None, :].astype(jnp.float32)
  b2 = b2[None, :].astype(jnp.float32)
  b3 = b3[None, :].astype(jnp.float32)
  b4 = b4[None, :].astype(jnp.float32)

  # --- Batch tiling / padding ----------------------------------------------
  tile = min(batch_tile, _round_up(B, 8))
  tile = _round_up(tile, 8)
  B_pad = _round_up(B, tile)
  if B_pad != B:
    x = jnp.pad(x, ((0, B_pad - B), (0, 0)))

  grid = (B_pad // tile,)

  def full(shape):
    # Whole-array block, replicated across the batch grid.
    return pl.BlockSpec(shape, lambda i: (0, 0))

  in_specs = [
      pl.BlockSpec((tile, D), lambda i: (i, 0)),          # x
      full(w1.shape), full(b1.shape),
      full(w2.shape), full(b2.shape),
      full(w3.shape), full(b3.shape),
      full(w4.shape), full(b4.shape),
  ]
  out_specs = pl.BlockSpec((tile, out_pad), lambda i: (i, 0))

  out = pl.pallas_call(
      functools.partial(_mlp_kernel, compute_dtype=compute_dtype),
      out_shape=jax.ShapeDtypeStruct((B_pad, out_pad), jnp.float32),
      grid=grid,
      in_specs=in_specs,
      out_specs=out_specs,
      compiler_params=pltpu.CompilerParams(
          dimension_semantics=("parallel",)),
  )(x, w1, b1, w2, b2, w3, b3, w4, b4)

  return out[:B, :num_classes]


def init_params(key, input_dim, num_classes):
  """Deterministic parameter init (PyTorch-like uniform for Linear layers)."""
  dims = [(input_dim, 128), (128, 64), (64, 32), (32, num_classes)]
  params = {}
  keys = jax.random.split(key, 32)
  ki = 0
  for idx, (fan_in, fan_out) in enumerate(dims, start=1):
    bound = 1.0 / jnp.sqrt(float(fan_in))
    # stored as (in, out) -> kernel computes x @ W
    params[f"w{idx}"] = jax.random.uniform(
        keys[ki], (fan_in, fan_out), jnp.float32, -bound, bound); ki += 1
    params[f"b{idx}"] = jax.random.uniform(
        keys[ki], (fan_out,), jnp.float32, -bound, bound); ki += 1
  # BatchNorm1d params + running stats (perturbed from defaults, deterministic).
  for idx, feat in enumerate([128, 64, 32], start=1):
    params[f"g{idx}"] = 1.0 + 0.1 * jax.random.normal(
        keys[ki], (feat,), jnp.float32); ki += 1
    params[f"be{idx}"] = 0.1 * jax.random.normal(
        keys[ki], (feat,), jnp.float32); ki += 1
    params[f"rm{idx}"] = 0.05 * jax.random.normal(
        keys[ki], (feat,), jnp.float32); ki += 1
    params[f"rv{idx}"] = 1.0 + 0.1 * jax.random.uniform(
        keys[ki], (feat,), jnp.float32); ki += 1
  return params


def _reference_forward(x, params):
  eps = 1e-5
  h = x
  for idx in (1, 2, 3):
    h = h @ params[f"w{idx}"] + params[f"b{idx}"]
    h = jnp.maximum(h, 0.0)
    h = (h - params[f"rm{idx}"]) / jnp.sqrt(params[f"rv{idx}"] + eps)
    h = h * params[f"g{idx}"] + params[f"be{idx}"]
  return h @ params["w4"] + params["b4"]


if __name__ == "__main__":
  key = jax.random.PRNGKey(0)
  input_dim = 32
  num_classes = 4

  k_param, k_x1, k_x2 = jax.random.split(key, 3)
  params = init_params(k_param, input_dim, num_classes)

  # Small-shape check (f32 path, tight tolerance).
  batch = 8
  x_small = jax.random.normal(k_x1, (batch, input_dim), jnp.float32)
  out = jax.block_until_ready(simple_cell_net_forward(x_small, params))
  ref = _reference_forward(x_small, params)
  assert out.shape == (batch, num_classes)
  assert jnp.allclose(out, ref, atol=1e-4, rtol=1e-4)

  # Larger, non-tile-multiple batch (exercises padding + multi-step parallel
  # grid), f32 path.
  big_batch = 1000
  x_big = jax.random.normal(k_x2, (big_batch, input_dim), jnp.float32)
  out_big = jax.block_until_ready(
      simple_cell_net_forward(x_big, params, batch_tile=512))
  ref_big = _reference_forward(x_big, params)
  assert out_big.shape == (big_batch, num_classes)
  assert jnp.allclose(out_big, ref_big, atol=1e-4, rtol=1e-4)

  # bf16 matmul-input path (f32 accumulation) — looser tolerance.
  out_bf16 = jax.block_until_ready(
      simple_cell_net_forward(x_big, params, batch_tile=512,
                              compute_dtype=jnp.bfloat16))
  assert jnp.allclose(out_bf16, ref_big, atol=5e-2, rtol=5e-2)

  print("KERNEL_OK")
</pallas_src>

<mosaic_0001>
module attributes {stable_mosaic.version = 11 : i64} {
  func.func @_mlp_kernel(%arg0: i32, %arg1: memref<8x32xf32, #tpu.memory_space<vmem>>, %arg2: memref<32x128xf32, #tpu.memory_space<vmem>>, %arg3: memref<1x128xf32, #tpu.memory_space<vmem>>, %arg4: memref<128x64xf32, #tpu.memory_space<vmem>>, %arg5: memref<1x64xf32, #tpu.memory_space<vmem>>, %arg6: memref<64x32xf32, #tpu.memory_space<vmem>>, %arg7: memref<1x32xf32, #tpu.memory_space<vmem>>, %arg8: memref<32x128xf32, #tpu.memory_space<vmem>>, %arg9: memref<1x128xf32, #tpu.memory_space<vmem>>, %arg10: memref<8x128xf32, #tpu.memory_space<vmem>>) attributes {dimension_semantics = [#tpu.dimension_semantics<parallel>], iteration_bounds = array<i64: 1>, scalar_prefetch = 0 : i64, scratch_operands = 0 : i64, tpu.core_type = #tpu.core_type<tc>, window_params = [{transform_indices = @transform_0, window_bounds = array<i64: 8, 32>}, {pipeline_mode = #tpu.pipeline_mode<synchronous>, transform_indices = @transform_1, window_bounds = array<i64: 32, 128>}, {pipeline_mode = #tpu.pipeline_mode<synchronous>, transform_indices = @transform_2, window_bounds = array<i64: 1, 128>}, {pipeline_mode = #tpu.pipeline_mode<synchronous>, transform_indices = @transform_3, window_bounds = array<i64: 128, 64>}, {pipeline_mode = #tpu.pipeline_mode<synchronous>, transform_indices = @transform_4, window_bounds = array<i64: 1, 64>}, {pipeline_mode = #tpu.pipeline_mode<synchronous>, transform_indices = @transform_5, window_bounds = array<i64: 64, 32>}, {pipeline_mode = #tpu.pipeline_mode<synchronous>, transform_indices = @transform_6, window_bounds = array<i64: 1, 32>}, {pipeline_mode = #tpu.pipeline_mode<synchronous>, transform_indices = @transform_7, window_bounds = array<i64: 32, 128>}, {pipeline_mode = #tpu.pipeline_mode<synchronous>, transform_indices = @transform_8, window_bounds = array<i64: 1, 128>}, {transform_indices = @transform_9, window_bounds = array<i64: 8, 128>}]} {
    %c0 = arith.constant 0 : index
    %c0_0 = arith.constant 0 : index
    %0 = vector.load %arg1[%c0, %c0_0] : memref<8x32xf32, #tpu.memory_space<vmem>>, vector<8x32xf32>
    %c0_1 = arith.constant 0 : index
    %c0_2 = arith.constant 0 : index
    %1 = vector.load %arg2[%c0_1, %c0_2] : memref<32x128xf32, #tpu.memory_space<vmem>>, vector<32x128xf32>
    %cst = arith.constant dense<0.000000e+00> : vector<8x128xf32>
    %2 = tpu.matmul %0, %1, %cst {dimension_numbers = #tpu.dot_dimension_numbers<[1], [0], [0], [1], [0, 0, 1, 1], [], []>} : vector<8x32xf32>, vector<32x128xf32>, vector<8x128xf32> -> vector<8x128xf32>
    %c0_3 = arith.constant 0 : index
    %c0_4 = arith.constant 0 : index
    %3 = vector.load %arg3[%c0_3, %c0_4] : memref<1x128xf32, #tpu.memory_space<vmem>>, vector<1x128xf32>
    %4 = vector.broadcast %3 : vector<1x128xf32> to vector<8x128xf32>
    %5 = arith.addf %2, %4 : vector<8x128xf32>
    %cst_5 = arith.constant 0.000000e+00 : f32
    %6 = vector.broadcast %cst_5 : f32 to vector<8x128xf32>
    %7 = arith.maximumf %5, %6 : vector<8x128xf32>
    %c0_6 = arith.constant 0 : index
    %c0_7 = arith.constant 0 : index
    %8 = vector.load %arg4[%c0_6, %c0_7] : memref<128x64xf32, #tpu.memory_space<vmem>>, vector<128x64xf32>
    %cst_8 = arith.constant dense<0.000000e+00> : vector<8x64xf32>
    %9 = tpu.matmul %7, %8, %cst_8 {dimension_numbers = #tpu.dot_dimension_numbers<[1], [0], [0], [1], [0, 0, 1, 1], [], []>} : vector<8x128xf32>, vector<128x64xf32>, vector<8x64xf32> -> vector<8x64xf32>
    %c0_9 = arith.constant 0 : index
    %c0_10 = arith.constant 0 : index
    %10 = vector.load %arg5[%c0_9, %c0_10] : memref<1x64xf32, #tpu.memory_space<vmem>>, vector<1x64xf32>
    %11 = vector.broadcast %10 : vector<1x64xf32> to vector<8x64xf32>
    %12 = arith.addf %9, %11 : vector<8x64xf32>
    %cst_11 = arith.constant 0.000000e+00 : f32
    %13 = vector.broadcast %cst_11 : f32 to vector<8x64xf32>
    %14 = arith.maximumf %12, %13 : vector<8x64xf32>
    %c0_12 = arith.constant 0 : index
    %c0_13 = arith.constant 0 : index
    %15 = vector.load %arg6[%c0_12, %c0_13] : memref<64x32xf32, #tpu.memory_space<vmem>>, vector<64x32xf32>
    %cst_14 = arith.constant dense<0.000000e+00> : vector<8x32xf32>
    %16 = tpu.matmul %14, %15, %cst_14 {dimension_numbers = #tpu.dot_dimension_numbers<[1], [0], [0], [1], [0, 0, 1, 1], [], []>} : vector<8x64xf32>, vector<64x32xf32>, vector<8x32xf32> -> vector<8x32xf32>
    %c0_15 = arith.constant 0 : index
    %c0_16 = arith.constant 0 : index
    %17 = vector.load %arg7[%c0_15, %c0_16] : memref<1x32xf32, #tpu.memory_space<vmem>>, vector<1x32xf32>
    %18 = vector.broadcast %17 : vector<1x32xf32> to vector<8x32xf32>
    %19 = arith.addf %16, %18 : vector<8x32xf32>
    %cst_17 = arith.constant 0.000000e+00 : f32
    %20 = vector.broadcast %cst_17 : f32 to vector<8x32xf32>
    %21 = arith.maximumf %19, %20 : vector<8x32xf32>
    %c0_18 = arith.constant 0 : index
    %c0_19 = arith.constant 0 : index
    %22 = vector.load %arg8[%c0_18, %c0_19] : memref<32x128xf32, #tpu.memory_space<vmem>>, vector<32x128xf32>
    %cst_20 = arith.constant dense<0.000000e+00> : vector<8x128xf32>
    %23 = tpu.matmul %21, %22, %cst_20 {dimension_numbers = #tpu.dot_dimension_numbers<[1], [0], [0], [1], [0, 0, 1, 1], [], []>} : vector<8x32xf32>, vector<32x128xf32>, vector<8x128xf32> -> vector<8x128xf32>
    %c0_21 = arith.constant 0 : index
    %c0_22 = arith.constant 0 : index
    %24 = vector.load %arg9[%c0_21, %c0_22] : memref<1x128xf32, #tpu.memory_space<vmem>>, vector<1x128xf32>
    %25 = vector.broadcast %24 : vector<1x128xf32> to vector<8x128xf32>
    %26 = arith.addf %23, %25 : vector<8x128xf32>
    %c0_23 = arith.constant 0 : index
    %c0_24 = arith.constant 0 : index
    %27 = vector.load %arg10[%c0_23, %c0_24] : memref<8x128xf32, #tpu.memory_space<vmem>>, vector<8x128xf32>
    tpu.vector_store %arg10[%c0_23, %c0_24], %26 {strides = array<i32>} : memref<8x128xf32, #tpu.memory_space<vmem>>, vector<8x128xf32>,
    return
  }
  func.func @transform_0(%arg0: i32) -> (i32, i32) {
    %c0_i32 = arith.constant 0 : i32
    %c0_i32_0 = arith.constant 0 : i32
    return %arg0, %c0_i32 : i32, i32
  }
  func.func @transform_1(%arg0: i32) -> (i32, i32) {
    %c0_i32 = arith.constant 0 : i32
    %c0_i32_0 = arith.constant 0 : i32
    %c0_i32_1 = arith.constant 0 : i32
    return %c0_i32, %c0_i32_0 : i32, i32
  }
  func.func @transform_2(%arg0: i32) -> (i32, i32) {
    %c0_i32 = arith.constant 0 : i32
    %c0_i32_0 = arith.constant 0 : i32
    %c0_i32_1 = arith.constant 0 : i32
    return %c0_i32, %c0_i32_0 : i32, i32
  }
  func.func @transform_3(%arg0: i32) -> (i32, i32) {
    %c0_i32 = arith.constant 0 : i32
    %c0_i32_0 = arith.constant 0 : i32
    %c0_i32_1 = arith.constant 0 : i32
    return %c0_i32, %c0_i32_0 : i32, i32
  }
  func.func @transform_4(%arg0: i32) -> (i32, i32) {
    %c0_i32 = arith.constant 0 : i32
    %c0_i32_0 = arith.constant 0 : i32
    %c0_i32_1 = arith.constant 0 : i32
    return %c0_i32, %c0_i32_0 : i32, i32
  }
  func.func @transform_5(%arg0: i32) -> (i32, i32) {
    %c0_i32 = arith.constant 0 : i32
    %c0_i32_0 = arith.constant 0 : i32
    %c0_i32_1 = arith.constant 0 : i32
    return %c0_i32, %c0_i32_0 : i32, i32
  }
  func.func @transform_6(%arg0: i32) -> (i32, i32) {
    %c0_i32 = arith.constant 0 : i32
    %c0_i32_0 = arith.constant 0 : i32
    %c0_i32_1 = arith.constant 0 : i32
    return %c0_i32, %c0_i32_0 : i32, i32
  }
  func.func @transform_7(%arg0: i32) -> (i32, i32) {
    %c0_i32 = arith.constant 0 : i32
    %c0_i32_0 = arith.constant 0 : i32
    %c0_i32_1 = arith.constant 0 : i32
    return %c0_i32, %c0_i32_0 : i32, i32
  }
  func.func @transform_8(%arg0: i32) -> (i32, i32) {
    %c0_i32 = arith.constant 0 : i32
    %c0_i32_0 = arith.constant 0 : i32
    %c0_i32_1 = arith.constant 0 : i32
    return %c0_i32, %c0_i32_0 : i32, i32
  }
  func.func @transform_9(%arg0: i32) -> (i32, i32) {
    %c0_i32 = arith.constant 0 : i32
    %c0_i32_0 = arith.constant 0 : i32
    return %arg0, %c0_i32 : i32, i32
  }
}

</mosaic_0001>

<bundles_post_ra>
// kernel: tpu_custom_call.1
= control target key start
LH: loop header
LB: loop body
LE: loop exit
PB: predicated region body
PF: predicated region fallthrough
CT: control target
= control target key end

     0   :  { %v547_v1 = vmov 0.0   ;;  %vm548_vm0 = vmmov 0   ;;  %vm45_vm1 = vcmask 261120   ;;  %s756_s0 = inlined_call_operand.vmem [shape: f32[8,32], index: 0, kind: input, shape index: {}]   ;;  %s757_s1 = inlined_call_operand.vmem [shape: f32[32,128], index: 1, kind: input, shape index: {}]   ;;  %s758_s2 = inlined_call_operand.vmem [shape: f32[1,128], index: 2, kind: input, shape index: {}]   ;;  %s759_s3 = inlined_call_operand.vmem [shape: f32[128,64], index: 3, kind: input, shape index: {}]   ;;  %s760_s4 = inlined_call_operand.vmem [shape: f32[1,64], index: 4, kind: input, shape index: {}]   ;;  %s761_s5 = inlined_call_operand.vmem [shape: f32[64,32], index: 5, kind: input, shape index: {}]   ;;  %s762_s6 = inlined_call_operand.vmem [shape: f32[1,32], index: 6, kind: input, shape index: {}]   ;;  %s763_s7 = inlined_call_operand.vmem [shape: f32[32,128], index: 7, kind: input, shape index: {}]   ;;  %s764_s8 = inlined_call_operand.vmem [shape: f32[1,128], index: 8, kind: input, shape index: {}]   ;;  %s765_s9 = inlined_call_operand.hbm [shape: f32[8,128], index: 9, kind: output, shape index: {}]  }
   0x1   :  { %v37_v0 = vld [vmem:[%s757_s1 + $0x18] sm:$0xff]  ;;  %446 = vmatprep.subr.mxu0 %v547_v1  ;;  %v36_v2 = vld [vmem:[%s757_s1 + $0x10] sm:$0xff]  ;;  %454 = vmatprep.mubr.msk.f32.mxu0 %vm548_vm0, %v547_v1  ;;  %v35_v5 = vld [vmem:[%s757_s1 + $0x8] sm:$0xff] }
   0x2   :  { %v135_v3 = vld [vmem:[%s759_s3 + $0x78] sm:$0xff]  ;;  %447 = vmatpush3.msra.mxu0 %v37_v0  ;;  %457 = vmatprep.subr.mxu1 %v547_v1  ;;  %v134_v4 = vld [vmem:[%s759_s3 + $0x70] sm:$0xff]  ;;  %v133_v6 = vld [vmem:[%s759_s3 + $0x68] sm:$0xff] }
   0x3   :  { %448 = vmatprep.subr.mxu0 %v547_v1  ;;  %458 = vmatpush3.msra.mxu1 %v135_v3  ;;  %v34_v7 = vld [vmem:[%s757_s1] sm:$0xff] }
   0x4   :  { %449 = vmatpush3.msra.mxu0 %v36_v2  ;;  %459 = vmatprep.subr.mxu1 %v547_v1  ;;  %v33_v8 = vld [vmem:[%s756_s0] sm:$0xff] }
   0x5   :  { %450 = vmatprep.subr.mxu0 %v547_v1  ;;  %460 = vmatpush3.msra.mxu1 %v134_v4  ;;  %v132_v9 = vld [vmem:[%s759_s3 + $0x60] sm:$0xff] }
   0x6   :  { %451 = vmatpush3.msra.mxu0 %v35_v5  ;;  %461 = vmatprep.subr.mxu1 %v547_v1 }
   0x7   :  { %14 = vsyncpa [#allocation3], 0  ;;  %452 = vmatprep.subr.mxu0 %v547_v1  ;;  %462 = vmatpush3.msra.mxu1 %v133_v6  ;;  %v131_v10 = vld [vmem:[%s759_s3 + $0x58] sm:$0xff]  ;;  %v130_v11 = vld [vmem:[%s759_s3 + $0x50] sm:$0xff]  ;;  %vm229_vm2 = vcmask 523264   ;;  %s549_s10 = smov [#allocation2]  }
   0x8   :  { %453 = vmatpush3.msra.mxu0 %v34_v7  ;;  %463 = vmatprep.subr.mxu1 %v547_v1  ;;  %v129_v12 = vld [vmem:[%s759_s3 + $0x48] sm:$0xff]  ;;  %v128_v13 = vld [vmem:[%s759_s3 + $0x40] sm:$0xff]  ;;  %v127_v14 = vld [vmem:[%s759_s3 + $0x38] sm:$0xff] }
   0x9   :  { %455 = vmatmul.mubr.msk.f32.vlgmr.msra.gmra.mxu0 %vm45_vm1, %v33_v8  ;;  %464 = vmatpush3.msra.mxu1 %v132_v9  ;;  %v126_v15 = vld [vmem:[%s759_s3 + $0x30] sm:$0xff]  ;;  %v125_v16 = vld [vmem:[%s759_s3 + $0x28] sm:$0xff]  ;;  %v124_v17 = vld [vmem:[%s759_s3 + $0x20] sm:$0xff] }
   0xa   :  { %465 = vmatprep.subr.mxu1 %v547_v1  ;;  %489 = vmatprep.mubr.msk.f32.mxu1 %vm548_vm0, %v547_v1  ;;  %v123_v18 = vld [vmem:[%s759_s3 + $0x18] sm:$0xff]  ;;  %v122_v19 = vld [vmem:[%s759_s3 + $0x10] sm:$0xff]  ;;  %v121_v20 = vld [vmem:[%s759_s3 + $0x8] sm:$0xff] }
   0xb   :  { %466 = vmatpush3.msra.mxu1 %v131_v10  ;;  %492 = vmatprep.subr.mxu0 %v547_v1  ;;  %v120_v21 = vld [vmem:[%s759_s3] sm:$0xff]  ;;  %v221_v22 = vld [vmem:[%s761_s5 + $0x38] sm:$0xff]  ;;  %v220_v23 = vld [vmem:[%s761_s5 + $0x30] sm:$0xff]  ;;  %s395_s3 = sshll.u32 %s549_s10, 4  ;;  %s396_s3 = int_to_ptr.vmem [resolvable:$true] %s395_s3 }
   0xc   :  { %467 = vmatprep.subr.mxu1 %v547_v1  ;;  %508 = vmatprep.mubr.msk.f32.mxu0 %vm548_vm0, %v547_v1  ;;  %v219_v24 = vld [vmem:[%s761_s5 + $0x28] sm:$0xff]  ;;  %v218_v25 = vld [vmem:[%s761_s5 + $0x20] sm:$0xff]  ;;  %v217_v26 = vld [vmem:[%s761_s5 + $0x18] sm:$0xff]  ;;  %p530_p1 = scmp.lt.s32.totalorder %s396_s3, %s396_s3 }
   0xd   :  { %468 = vmatpush3.msra.mxu1 %v130_v11  ;;  %493 = vmatpush3.msra.mxu0 %v221_v22  ;;  %v403_v27 = vld [vmem:[%s758_s2] ss:$0 sm:$0xff]  ;;  %v216_v32 = vld [vmem:[%s761_s5 + $0x10] sm:$0xff]  ;;  %v215_v33 = vld [vmem:[%s761_s5 + $0x8] sm:$0xff] }
   0xe   :  { %469 = vmatprep.subr.mxu1 %v547_v1  ;;  %494 = vmatprep.subr.mxu0 %v547_v1  ;;  %v214_v34 = vld [vmem:[%s761_s5] sm:$0xff]  ;;  %v307_v40 = vld [vmem:[%s763_s7 + $0x18] sm:$0xff]  ;;  %v306_v41 = vld [vmem:[%s763_s7 + $0x10] sm:$0xff] }
   0xf   :  { %470 = vmatpush3.msra.mxu1 %v129_v12  ;;  %495 = vmatpush3.msra.mxu0 %v220_v23  ;;  %v405_v35 = vld [vmem:[%s760_s4] ss:$0 sm:$0xff]  ;;  %v305_v42 = vld [vmem:[%s763_s7 + $0x8] sm:$0xff] }
  0x10   :  { %471 = vmatprep.subr.mxu1 %v547_v1  ;;  %496 = vmatprep.subr.mxu0 %v547_v1  ;;  %v304_v43 = vld [vmem:[%s763_s7] sm:$0xff]  ;;  %s525_s7 = scalar_lea.vmem %s396_s3, 128 }
  0x11   :  { %472 = vmatpush3.msra.mxu1 %v128_v13  ;;  %497 = vmatpush3.msra.mxu0 %v219_v24  ;;  %v406_v44 = vld [vmem:[%s762_s6] ss:$0 sm:$0xff]  ;;  %p526_p0 = scmp.ne.s32.totalorder %s396_s3, %s525_s7  ;;  %p531_p2 = scmp.lt.s32.totalorder %s525_s7, %s525_s7 }
  0x12   :  { %473 = vmatprep.subr.mxu1 %v547_v1  ;;  %498 = vmatprep.subr.mxu0 %v547_v1  ;;  %v408_v49 = vld [vmem:[%s764_s8] ss:$0 sm:$0xff] }
  0x13   :  { %474 = vmatpush3.msra.mxu1 %v127_v14  ;;  %499 = vmatpush3.msra.mxu0 %v218_v25  ;;  %p532_p3 = por %p531_p2, %p530_p1 }
  0x14   :  { %475 = vmatprep.subr.mxu1 %v547_v1  ;;  %500 = vmatprep.subr.mxu0 %v547_v1 }
  0x15   :  { %476 = vmatpush3.msra.mxu1 %v126_v15  ;;  %501 = vmatpush3.msra.mxu0 %v217_v26  ;;  %p533_p4 = pnand %p532_p3, %p526_p0 }
  0x16   :  { %477 = vmatprep.subr.mxu1 %v547_v1  ;;  %502 = vmatprep.subr.mxu0 %v547_v1 }
  0x17   :  { %478 = vmatpush3.msra.mxu1 %v125_v16  ;;  %503 = vmatpush3.msra.mxu0 %v216_v32 }
  0x18   :  { %479 = vmatprep.subr.mxu1 %v547_v1  ;;  %504 = vmatprep.subr.mxu0 %v547_v1 }
  0x19   :  { %480 = vmatpush3.msra.mxu1 %v124_v17  ;;  %505 = vmatpush3.msra.mxu0 %v215_v33 }
  0x1a   :  { %481 = vmatprep.subr.mxu1 %v547_v1  ;;  %506 = vmatprep.subr.mxu0 %v547_v1 }
  0x1b   :  { %482 = vmatpush3.msra.mxu1 %v123_v18  ;;  %507 = vmatpush3.msra.mxu0 %v214_v34 }
  0x1c   :  { %483 = vmatprep.subr.mxu1 %v547_v1  ;;  %511 = vmatprep.subr.mxu0 %v547_v1 }
  0x1d   :  { %484 = vmatpush3.msra.mxu1 %v122_v19 }
  0x1e   :  { %485 = vmatprep.subr.mxu1 %v547_v1 }
  0x1f   :  { %486 = vmatpush3.msra.mxu1 %v121_v20 }
  0x20   :  { %487 = vmatprep.subr.mxu1 %v547_v1 }
  0x21   :  { %488 = vmatpush3.msra.mxu1 %v120_v21 }
  0xc9   :  { %v115_v28 = vpop.f32.mrf.mxu0 }
  0xca   :  { %v116_v29 = vadd.f32 %v403_v27, %v115_v28 }
  0xcb   :  { %v456_v30 = vpop.f32.mrf.mxu0 }
  0xcc   :  { %v119_v31 = vmax.f32 %v116_v29, 0.0 }
  0xce   :  { %490 = vmatmul.mubr.f32.vlgmr.msra.gmra.mxu1 %v119_v31 }
 0x18e   :  { %v209_v36 = vpop.f32.mrf.mxu1 }
 0x18f   :  { %v210_v37 = vadd.f32 %v405_v35, %v209_v36 }
 0x190   :  { %v491_v38 = vpop.f32.mrf.mxu1 }
 0x191   :  { %v213_v39 = vmax.f32 %v210_v37, 0.0 }
 0x193   :  { %509 = vmatmul.mubr.msk.f32.vlgmr.msra.gmra.mxu0 %vm229_vm2, %v213_v39 }
 0x194   :  { %512 = vmatpush3.msra.mxu0 %v307_v40  ;;  %519 = vmatprep.mubr.msk.f32.mxu0 %vm548_vm0, %v547_v1 }
 0x195   :  { %513 = vmatprep.subr.mxu0 %v547_v1 }
 0x196   :  { %514 = vmatpush3.msra.mxu0 %v306_v41 }
 0x197   :  { %515 = vmatprep.subr.mxu0 %v547_v1 }
 0x198   :  { %516 = vmatpush3.msra.mxu0 %v305_v42 }
 0x199   :  { %517 = vmatprep.subr.mxu0 %v547_v1 }
 0x19a   :  { %518 = vmatpush3.msra.mxu0 %v304_v43 }
 0x253   :  { %v299_v45 = vpop.f32.mrf.mxu0 }
 0x254   :  { %v300_v46 = vadd.f32 %v406_v44, %v299_v45 }
 0x255   :  { %v510_v47 = vpop.f32.mrf.mxu0 }
 0x256   :  { %v303_v48 = vmax.f32 %v300_v46, 0.0 }
 0x258   :  { %520 = vmatmul.mubr.msk.f32.vlgmr.msra.gmra.mxu0 %vm45_vm1, %v303_v48 }
 0x318   :  { %v384_v50 = vpop.f32.mrf.mxu0 }
 0x319   :  { %v385_v51 = vadd.f32 %v408_v49, %v384_v50 }
 0x31a   :  { %v521_v52 = vpop.f32.mrf.mxu0 }
 0x31b   :  { %388 = vst [vmem:[#allocation2] sm:$0xff] %v385_v51 }
 0x31c   :  { %536 = shalt.err (!%p533_p4)
}
 0x31d   :  { %398 = dma.vmem_to_hbm [thread:$0]  %s396_s3, 128, %s765_s9, [#allocation3]  }
 0x31e   :  { %545 = dma.done.wait [#allocation3], 128  }
 0x31f   :  { %546 = vsyncadd [#allocation3], 4294967168 }
 0x320   :  { %402 = vsyncpa [#allocation3], 1 }

</bundles_post_ra>
